<compile_context>
chip_gen: v7x
topology: tpu7x:2x2x1
jax: 0.10.0
libtpu: 0.0.40
codegen_flags: <defaults>
</compile_context>

<pallas_src>
import jax
import jax.numpy as jnp
import numpy as np
from jax.experimental import pallas as pl
from jax.experimental.pallas import tpu as pltpu

FRAME_NUM = 9  # AvgPool2d kernel is hard-coded to (9, 1) in the module for pool_type='avg'


def _round_up(x, m):
    return ((x + m - 1) // m) * m


def videonet_kernel(x_ref, w1_ref, b1_ref, w2_ref, b2_ref, o_ref):
    # x_ref : (TILE_B, 9*D)   lane-dense batch tile (bf16 stream)
    # w1_ref: (D, H_pad)      (1/9 pooling scale pre-folded, bf16)
    # b1_ref: (1, H_pad)      (f32)
    # w2_ref: (H_pad, C_pad)  (bf16)
    # b2_ref: (1, C_pad)      (f32)
    # o_ref : (TILE_B, C_pad) (f32)
    D = w1_ref.shape[0]

    # AvgPool2d((9,1)): sum over the 9 frames as 9 lane-aligned VPU adds, f32 accumulation
    # (the 1/9 scale is folded into w1).
    acc = x_ref[:, pl.ds(0, D)].astype(jnp.float32)
    for f in range(1, FRAME_NUM):
        acc = acc + x_ref[:, pl.ds(f * D, D)].astype(jnp.float32)

    # fc1 + ReLU (MXU matmul in weight dtype, f32 accumulate)
    h = jnp.dot(acc.astype(w1_ref.dtype), w1_ref[...],
                preferred_element_type=jnp.float32) + b1_ref[...].astype(jnp.float32)
    h = jnp.maximum(h, 0.0)

    # dropout -> identity (eval mode)
    # TODO(synk): training-mode dropout (random mask + 1/(1-p) scaling) not implemented.

    # fc2
    out = jnp.dot(h.astype(w2_ref.dtype), w2_ref[...],
                  preferred_element_type=jnp.float32) + b2_ref[...].astype(jnp.float32)
    o_ref[...] = out.astype(o_ref.dtype)


def prepare_videonet_params(w1, b1, w2, b2, *, dtype=jnp.bfloat16):
    """Convert PyTorch nn.Linear params (out, in) to kernel layout.

    Returns (w1_t, b1_p, w2_t, b2_p, num_classes) with:
      * weights transposed to (in, out) and cast to `dtype` (bf16 by default),
      * 1/9 pooling scale folded into w1,
      * hidden dim padded to a multiple of 128, class dim padded to 128 (zero pad -> no-op),
      * biases kept in f32 (tiny; added after the f32-accumulated matmul).
    """
    H, D = w1.shape
    C = w2.shape[0]
    H_pad = _round_up(H, 128)
    C_pad = max(_round_up(C, 128), 128)

    w1_t = jnp.zeros((D, H_pad), dtype).at[:, :H].set(
        (w1.T.astype(jnp.float32) / FRAME_NUM).astype(dtype))
    b1_p = jnp.zeros((1, H_pad), jnp.float32).at[:, :H].set(
        b1.reshape(1, -1).astype(jnp.float32))
    w2_t = jnp.zeros((H_pad, C_pad), dtype).at[:H, :C].set(w2.T.astype(dtype))
    b2_p = jnp.zeros((1, C_pad), jnp.float32).at[:, :C].set(
        b2.reshape(1, -1).astype(jnp.float32))
    return w1_t, b1_p, w2_t, b2_p, C


def _hw_budget():
    """(batch_tile_cap, vmem_limit_bytes), gated on VMEM capacity; conservative fallback."""
    try:
        info = pltpu.get_tpu_info()
        vmem = getattr(info, "vmem_capacity_bytes", None)
        if vmem is not None and vmem >= 100 * 1024 * 1024:
            # v5e / v6e: 128 MiB VMEM -> bigger batch tile, fewer grid steps.
            return 512, 80 * 1024 * 1024
    except Exception:
        pass
    # v7x (64 MiB per-TC VMEM) or unknown: conservative.
    return 256, 40 * 1024 * 1024


def videonet_forward(x, w1_t, b1, w2_t, b2, num_classes, *, tile_b=None,
                     x_dtype=jnp.bfloat16):
    """x: (B, F, D) or (B, 1, F, D). Params from prepare_videonet_params. Returns (B, num_classes)."""
    if x.ndim == 4:  # NCHW with C == 1 (PyTorch 4D path)
        x = x[:, 0]
    B, F, D = x.shape
    assert F == FRAME_NUM, "AvgPool2d kernel (9,1) requires frame_num == 9"
    assert D % 128 == 0, "dense_feature_num must be a multiple of 128 for lane-aligned slices"
    H_pad = w1_t.shape[1]
    C_pad = w2_t.shape[1]

    cap, vmem_limit = _hw_budget()

    # Batch tiling: at least 2 grid steps (so the "parallel" axis can shard across v7x's two
    # TensorCores), tile_b a multiple of 8, minimal padding.
    if tile_b is None:
        n_tiles = max(2, pl.cdiv(B, cap))
        tile_b = _round_up(pl.cdiv(B, n_tiles), 8)
    n_tiles = pl.cdiv(B, tile_b)
    B_pad = n_tiles * tile_b

    # Lane-dense layout: (B, 9*D) -- free contiguous reshape; stream in bf16.
    x2 = x.reshape(B, F * D).astype(x_dtype)
    if B_pad != B:
        x2 = jnp.pad(x2, ((0, B_pad - B), (0, 0)))

    grid = (n_tiles,)

    itemsize_x = x2.dtype.itemsize
    itemsize_w = w1_t.dtype.itemsize
    cost = pl.CostEstimate(
        flops=2 * B_pad * (D * H_pad + H_pad * C_pad),
        transcendentals=0,
        bytes_accessed=(B_pad * F * D * itemsize_x
                        + (D * H_pad + H_pad * C_pad) * itemsize_w
                        + (H_pad + C_pad) * 4
                        + B_pad * C_pad * 4),
    )

    out = pl.pallas_call(
        videonet_kernel,
        out_shape=jax.ShapeDtypeStruct((B_pad, C_pad), jnp.float32),
        grid=grid,
        in_specs=[
            pl.BlockSpec((tile_b, F * D), lambda i: (i, 0)),   # x: batch-tiled, double-buffered
            pl.BlockSpec((D, H_pad), lambda i: (0, 0)),        # w1: resident across grid steps
            pl.BlockSpec((1, H_pad), lambda i: (0, 0)),        # b1
            pl.BlockSpec((H_pad, C_pad), lambda i: (0, 0)),    # w2
            pl.BlockSpec((1, C_pad), lambda i: (0, 0)),        # b2
        ],
        out_specs=pl.BlockSpec((tile_b, C_pad), lambda i: (i, 0)),
        compiler_params=pltpu.CompilerParams(
            dimension_semantics=("parallel",),
            vmem_limit_bytes=vmem_limit,
        ),
        cost_estimate=cost,
    )(x2, w1_t, b1, w2_t, b2)

    return out[:B, :num_classes]


if __name__ == "__main__":
    # Small shapes consistent with the module's forward:
    B = 2            # batch
    F = FRAME_NUM    # frames = 9 (pool kernel is hard-coded (9,1))
    D = 256          # dense_feature_num (small stand-in for 1024; multiple of 128)
    H = 200          # hidden_num (small stand-in for 2000; exercises pad-to-128)
    C = 7            # num_classes

    key = jax.random.PRNGKey(0)
    kx, kw1, kb1, kw2, kb2 = jax.random.split(key, 5)

    x = jax.random.normal(kx, (B, F, D), dtype=jnp.float32)
    # PyTorch nn.Linear layout: weight (out, in), bias (out,)
    w1 = jax.random.normal(kw1, (H, D), dtype=jnp.float32) * 0.02
    b1 = jax.random.normal(kb1, (H,), dtype=jnp.float32) * 0.02
    w2 = jax.random.normal(kw2, (C, H), dtype=jnp.float32) * 0.02
    b2 = jax.random.normal(kb2, (C,), dtype=jnp.float32) * 0.02

    # One-time weight prep: transpose, fold 1/9, pad H/C to lane multiples, cast to bf16.
    w1_t, b1_p, w2_t, b2_p, num_classes = prepare_videonet_params(
        w1, b1, w2, b2, dtype=jnp.bfloat16)

    out = videonet_forward(x, w1_t, b1_p, w2_t, b2_p, num_classes)
    out = jax.block_until_ready(out)

    # Pure-JAX f32 reference of the original module's math (dropout = identity in eval).
    pooled_ref = jnp.mean(x, axis=1)                       # AvgPool2d((9,1)) over 9 frames
    h_ref = jnp.maximum(pooled_ref @ w1.T + b1, 0.0)       # fc1 + ReLU
    ref = h_ref @ w2.T + b2                                # fc2
    # bf16 activations/weights vs f32 reference -> loosened tolerances (expected, not a bug).
    np.testing.assert_allclose(np.asarray(out), np.asarray(ref), rtol=2e-2, atol=2e-2)
    assert out.shape == (B, C)

    print("KERNEL_OK")
</pallas_src>

<mosaic_0001>
module attributes {stable_mosaic.version = 11 : i64} {
  func.func @videonet_kernel(%arg0: i32, %arg1: memref<8x2304xbf16, #tpu.memory_space<vmem>>, %arg2: memref<256x256xbf16, #tpu.memory_space<vmem>>, %arg3: memref<1x256xf32, #tpu.memory_space<vmem>>, %arg4: memref<256x128xbf16, #tpu.memory_space<vmem>>, %arg5: memref<1x128xf32, #tpu.memory_space<vmem>>, %arg6: memref<8x128xf32, #tpu.memory_space<vmem>>) attributes {dimension_semantics = [#tpu.dimension_semantics<parallel>], iteration_bounds = array<i64: 1>, scalar_prefetch = 0 : i64, scratch_operands = 0 : i64, tpu.core_type = #tpu.core_type<tc>, window_params = [{transform_indices = @transform_0, window_bounds = array<i64: 8, 2304>}, {pipeline_mode = #tpu.pipeline_mode<synchronous>, transform_indices = @transform_1, window_bounds = array<i64: 256, 256>}, {pipeline_mode = #tpu.pipeline_mode<synchronous>, transform_indices = @transform_2, window_bounds = array<i64: 1, 256>}, {pipeline_mode = #tpu.pipeline_mode<synchronous>, transform_indices = @transform_3, window_bounds = array<i64: 256, 128>}, {pipeline_mode = #tpu.pipeline_mode<synchronous>, transform_indices = @transform_4, window_bounds = array<i64: 1, 128>}, {transform_indices = @transform_5, window_bounds = array<i64: 8, 128>}]} {
    %c0 = arith.constant 0 : index
    %c0_0 = arith.constant 0 : index
    %0 = vector.load %arg1[%c0, %c0_0] : memref<8x2304xbf16, #tpu.memory_space<vmem>>, vector<8x256xbf16>
    %1 = arith.extf %0 : vector<8x256xbf16> to vector<8x256xf32>
    %c0_1 = arith.constant 0 : index
    %c256 = arith.constant 256 : index
    %2 = vector.load %arg1[%c0_1, %c256] : memref<8x2304xbf16, #tpu.memory_space<vmem>>, vector<8x256xbf16>
    %3 = arith.extf %2 : vector<8x256xbf16> to vector<8x256xf32>
    %4 = arith.addf %1, %3 : vector<8x256xf32>
    %c0_2 = arith.constant 0 : index
    %c512 = arith.constant 512 : index
    %5 = vector.load %arg1[%c0_2, %c512] : memref<8x2304xbf16, #tpu.memory_space<vmem>>, vector<8x256xbf16>
    %6 = arith.extf %5 : vector<8x256xbf16> to vector<8x256xf32>
    %7 = arith.addf %4, %6 : vector<8x256xf32>
    %c0_3 = arith.constant 0 : index
    %c768 = arith.constant 768 : index
    %8 = vector.load %arg1[%c0_3, %c768] : memref<8x2304xbf16, #tpu.memory_space<vmem>>, vector<8x256xbf16>
    %9 = arith.extf %8 : vector<8x256xbf16> to vector<8x256xf32>
    %10 = arith.addf %7, %9 : vector<8x256xf32>
    %c0_4 = arith.constant 0 : index
    %c1024 = arith.constant 1024 : index
    %11 = vector.load %arg1[%c0_4, %c1024] : memref<8x2304xbf16, #tpu.memory_space<vmem>>, vector<8x256xbf16>
    %12 = arith.extf %11 : vector<8x256xbf16> to vector<8x256xf32>
    %13 = arith.addf %10, %12 : vector<8x256xf32>
    %c0_5 = arith.constant 0 : index
    %c1280 = arith.constant 1280 : index
    %14 = vector.load %arg1[%c0_5, %c1280] : memref<8x2304xbf16, #tpu.memory_space<vmem>>, vector<8x256xbf16>
    %15 = arith.extf %14 : vector<8x256xbf16> to vector<8x256xf32>
    %16 = arith.addf %13, %15 : vector<8x256xf32>
    %c0_6 = arith.constant 0 : index
    %c1536 = arith.constant 1536 : index
    %17 = vector.load %arg1[%c0_6, %c1536] : memref<8x2304xbf16, #tpu.memory_space<vmem>>, vector<8x256xbf16>
    %18 = arith.extf %17 : vector<8x256xbf16> to vector<8x256xf32>
    %19 = arith.addf %16, %18 : vector<8x256xf32>
    %c0_7 = arith.constant 0 : index
    %c1792 = arith.constant 1792 : index
    %20 = vector.load %arg1[%c0_7, %c1792] : memref<8x2304xbf16, #tpu.memory_space<vmem>>, vector<8x256xbf16>
    %21 = arith.extf %20 : vector<8x256xbf16> to vector<8x256xf32>
    %22 = arith.addf %19, %21 : vector<8x256xf32>
    %c0_8 = arith.constant 0 : index
    %c2048 = arith.constant 2048 : index
    %23 = vector.load %arg1[%c0_8, %c2048] : memref<8x2304xbf16, #tpu.memory_space<vmem>>, vector<8x256xbf16>
    %24 = arith.extf %23 : vector<8x256xbf16> to vector<8x256xf32>
    %25 = arith.addf %22, %24 : vector<8x256xf32>
    %26 = arith.truncf %25 : vector<8x256xf32> to vector<8x256xbf16>
    %c0_9 = arith.constant 0 : index
    %c0_10 = arith.constant 0 : index
    %27 = vector.load %arg2[%c0_9, %c0_10] : memref<256x256xbf16, #tpu.memory_space<vmem>>, vector<256x256xbf16>
    %cst = arith.constant dense<0.000000e+00> : vector<8x256xf32>
    %28 = tpu.matmul %26, %27, %cst {dimension_numbers = #tpu.dot_dimension_numbers<[1], [0], [0], [1], [0, 0, 1, 1], [], []>} : vector<8x256xbf16>, vector<256x256xbf16>, vector<8x256xf32> -> vector<8x256xf32>
    %c0_11 = arith.constant 0 : index
    %c0_12 = arith.constant 0 : index
    %29 = vector.load %arg3[%c0_11, %c0_12] : memref<1x256xf32, #tpu.memory_space<vmem>>, vector<1x256xf32>
    %30 = vector.broadcast %29 : vector<1x256xf32> to vector<8x256xf32>
    %31 = arith.addf %28, %30 : vector<8x256xf32>
    %cst_13 = arith.constant 0.000000e+00 : f32
    %32 = vector.broadcast %cst_13 : f32 to vector<8x256xf32>
    %33 = arith.maximumf %31, %32 : vector<8x256xf32>
    %34 = arith.truncf %33 : vector<8x256xf32> to vector<8x256xbf16>
    %c0_14 = arith.constant 0 : index
    %c0_15 = arith.constant 0 : index
    %35 = vector.load %arg4[%c0_14, %c0_15] : memref<256x128xbf16, #tpu.memory_space<vmem>>, vector<256x128xbf16>
    %cst_16 = arith.constant dense<0.000000e+00> : vector<8x128xf32>
    %36 = tpu.matmul %34, %35, %cst_16 {dimension_numbers = #tpu.dot_dimension_numbers<[1], [0], [0], [1], [0, 0, 1, 1], [], []>} : vector<8x256xbf16>, vector<256x128xbf16>, vector<8x128xf32> -> vector<8x128xf32>
    %c0_17 = arith.constant 0 : index
    %c0_18 = arith.constant 0 : index
    %37 = vector.load %arg5[%c0_17, %c0_18] : memref<1x128xf32, #tpu.memory_space<vmem>>, vector<1x128xf32>
    %38 = vector.broadcast %37 : vector<1x128xf32> to vector<8x128xf32>
    %39 = arith.addf %36, %38 : vector<8x128xf32>
    %c0_19 = arith.constant 0 : index
    %c0_20 = arith.constant 0 : index
    %40 = vector.load %arg6[%c0_19, %c0_20] : memref<8x128xf32, #tpu.memory_space<vmem>>, vector<8x128xf32>
    tpu.vector_store %arg6[%c0_19, %c0_20], %39 {strides = array<i32>} : memref<8x128xf32, #tpu.memory_space<vmem>>, vector<8x128xf32>,
    return
  }
  func.func @transform_0(%arg0: i32) -> (i32, i32) {
    %c0_i32 = arith.constant 0 : i32
    %c0_i32_0 = arith.constant 0 : i32
    return %arg0, %c0_i32 : i32, i32
  }
  func.func @transform_1(%arg0: i32) -> (i32, i32) {
    %c0_i32 = arith.constant 0 : i32
    %c0_i32_0 = arith.constant 0 : i32
    %c0_i32_1 = arith.constant 0 : i32
    return %c0_i32, %c0_i32_0 : i32, i32
  }
  func.func @transform_2(%arg0: i32) -> (i32, i32) {
    %c0_i32 = arith.constant 0 : i32
    %c0_i32_0 = arith.constant 0 : i32
    %c0_i32_1 = arith.constant 0 : i32
    return %c0_i32, %c0_i32_0 : i32, i32
  }
  func.func @transform_3(%arg0: i32) -> (i32, i32) {
    %c0_i32 = arith.constant 0 : i32
    %c0_i32_0 = arith.constant 0 : i32
    %c0_i32_1 = arith.constant 0 : i32
    return %c0_i32, %c0_i32_0 : i32, i32
  }
  func.func @transform_4(%arg0: i32) -> (i32, i32) {
    %c0_i32 = arith.constant 0 : i32
    %c0_i32_0 = arith.constant 0 : i32
    %c0_i32_1 = arith.constant 0 : i32
    return %c0_i32, %c0_i32_0 : i32, i32
  }
  func.func @transform_5(%arg0: i32) -> (i32, i32) {
    %c0_i32 = arith.constant 0 : i32
    %c0_i32_0 = arith.constant 0 : i32
    return %arg0, %c0_i32 : i32, i32
  }
}

</mosaic_0001>

<bundles_post_ra>
// kernel: tpu_custom_call.1
= control target key start
LH: loop header
LB: loop body
LE: loop exit
PB: predicated region body
PF: predicated region fallthrough
CT: control target
= control target key end

     0   :  { %10 = vsyncpa [#allocation3], 0  ;;  %s896_s0 = inlined_call_operand.hbm [shape: bf16[8,2304], index: 0, kind: input, shape index: {}]   ;;  %s897_s1 = inlined_call_operand.hbm [shape: bf16[256,256], index: 1, kind: input, shape index: {}]   ;;  %s898_s2 = inlined_call_operand.vmem [shape: f32[1,256], index: 2, kind: input, shape index: {}]   ;;  %s899_s3 = inlined_call_operand.hbm [shape: bf16[256,128], index: 3, kind: input, shape index: {}]   ;;  %s900_s4 = inlined_call_operand.vmem [shape: f32[1,128], index: 4, kind: input, shape index: {}]   ;;  %s901_s5 = inlined_call_operand.hbm [shape: f32[8,128], index: 5, kind: output, shape index: {}]  }
   0x1   :  { %11 = vsyncpa [#allocation6], 0 }
   0x2   :  { %12 = vsyncpa [#allocation4], 0  ;;  %s784_s18 = smov [#allocation5]   ;;  %s690_s22 = scalar_lea.hbm %s897_s1, 4096 }
   0x3   :  { %s28_s19 = sshll.u32 %s784_s18, 4  ;;  %p691_p0 = scmp.ne.s32.totalorder %s897_s1, %s690_s22  ;;  %s29_s19 = int_to_ptr.vmem [resolvable:$true] %s28_s19 }
   0x4   :  { %p694_p1 = scmp.lt.u32.totalorder %s690_s22, %s897_s1 }
   0x6   :  { %p696_p2 = pnand %p694_p1, %p691_p0 }
   0x8   :  { %699 = shalt.err (!%p696_p2)
}
   0x9   :  { %s700_s27 = scalar_lea.vmem %s29_s19, 4096  ;;  %p705_p4 = scmp.lt.s32.totalorder %s29_s19, %s29_s19 }
   0xa   :  { %p701_p3 = scmp.ne.s32.totalorder %s29_s19, %s700_s27  ;;  %p706_p5 = scmp.lt.s32.totalorder %s700_s27, %s700_s27 }
   0xc   :  { %p707_p6 = por %p706_p5, %p705_p4 }
   0xe   :  { %p708_p7 = pnand %p707_p6, %p701_p3 }
  0x10   :  { %711 = shalt.err (!%p708_p7)
}
  0x11   :  { %s785_s28 = smov 128   ;;  %s786_s29 = smov 8  }
  0x12   :  { %34 = dma.hbm_to_vmem [thread:$0]  %s897_s1, 4096, %s29_s19, [#allocation6], %s785_s28, %s785_s28, %s786_s29  }
  0x13   :  { %s787_s7 = smov [#allocation2]   ;;  %s788_s9 = smov [#allocation7]  }
  0x14   :  { %s19_s8 = sshll.u32 %s787_s7, 4  ;;  %s42_s10 = sshll.u32 %s788_s9, 4  ;;  %s20_s8 = int_to_ptr.vmem [resolvable:$true] %s19_s8  ;;  %s43_s10 = int_to_ptr.vmem [resolvable:$true] %s42_s10 }
  0x15   :  { %s712_s13 = scalar_lea.hbm %s896_s0, 1152 }
  0x16   :  { %p713_p8 = scmp.ne.s32.totalorder %s896_s0, %s712_s13  ;;  %p716_p9 = scmp.lt.u32.totalorder %s712_s13, %s896_s0 }
  0x18   :  { %p718_p10 = pnand %p716_p9, %p713_p8 }
  0x1a   :  { %721 = shalt.err (!%p718_p10)
}
  0x1b   :  { %s722_s1 = scalar_lea.vmem %s20_s8, 1152  ;;  %p727_p12 = scmp.lt.s32.totalorder %s20_s8, %s20_s8 }
  0x1c   :  { %p723_p11 = scmp.ne.s32.totalorder %s20_s8, %s722_s1  ;;  %p728_p13 = scmp.lt.s32.totalorder %s722_s1, %s722_s1 }
  0x1e   :  { %p729_p0 = por %p728_p13, %p727_p12 }
  0x20   :  { %p730_p1 = pnand %p729_p0, %p723_p11 }
  0x22   :  { %733 = shalt.err (!%p730_p1)
}
  0x23   :  { %22 = dma.hbm_to_vmem [thread:$0]  %s896_s0, 1152, %s20_s8, [#allocation3]  }
  0x24   :  { %s734_s22 = scalar_lea.hbm %s899_s3, 2048 }
  0x25   :  { %p735_p2 = scmp.ne.s32.totalorder %s899_s3, %s734_s22  ;;  %p738_p3 = scmp.lt.u32.totalorder %s734_s22, %s899_s3 }
  0x27   :  { %p740_p4 = pnand %p738_p3, %p735_p2 }
  0x29   :  { %743 = shalt.err (!%p740_p4)
}
  0x2a   :  { %s744_s27 = scalar_lea.vmem %s43_s10, 2048  ;;  %p749_p6 = scmp.lt.s32.totalorder %s43_s10, %s43_s10 }
  0x2b   :  { %p745_p5 = scmp.ne.s32.totalorder %s43_s10, %s744_s27  ;;  %p750_p7 = scmp.lt.s32.totalorder %s744_s27, %s744_s27 }
  0x2d   :  { %p751_p8 = por %p750_p7, %p749_p6 }
  0x2f   :  { %p752_p9 = pnand %p751_p8, %p745_p5 }
  0x31   :  { %755 = shalt.err (!%p752_p9)
}
  0x32   :  { %s789_s0 = smov 64   ;;  %s790_s28 = smov 4  }
  0x33   :  { %48 = dma.hbm_to_vmem [thread:$0]  %s899_s3, 2048, %s43_s10, [#allocation6], %s789_s0, %s789_s0, %s790_s28  }
  0x34   :  { %778 = dma.done.wait [#allocation3], 1152  }
  0x35   :  { %779 = vsyncadd [#allocation3], 4294966144 }
  0x36   :  { %780 = dma.done.wait [#allocation6], 6144  }
  0x37   :  { %781 = vsyncadd [#allocation6], 4294961152  ;;  %v626_v0 = vld [vmem:[#allocation5 + $0x4] ss:$8 sps:$4 sm:$0xff]   ;;  %v628_v1 = vld [vmem:[#allocation5] ss:$8 sps:$4 sm:$0xff]  }
  0x38   :  { %310 = vmatprep.subr.bf16.mxu0 %v626_v0  ;;  %v629_v2 = vld [vmem:[#allocation5 + $0x14] ss:$8 sps:$4 sm:$0xff]   ;;  %v631_v3 = vld [vmem:[#allocation5 + $0x10] ss:$8 sps:$4 sm:$0xff]   ;;  %v632_v4 = vld [vmem:[#allocation5 + $0x24] ss:$8 sps:$4 sm:$0xff]  }
  0x39   :  { %311 = vmatpush1.bf16.msra.mxu0 %v628_v1  ;;  %v634_v5 = vld [vmem:[#allocation5 + $0x20] ss:$8 sps:$4 sm:$0xff]   ;;  %v635_v6 = vld [vmem:[#allocation5 + $0x34] ss:$8 sps:$4 sm:$0xff]   ;;  %v637_v7 = vld [vmem:[#allocation5 + $0x30] ss:$8 sps:$4 sm:$0xff]  }
  0x3a   :  { %312 = vmatprep.subr.bf16.mxu0 %v629_v2  ;;  %v638_v8 = vld [vmem:[#allocation5 + $0x44] ss:$8 sps:$4 sm:$0xff]   ;;  %v640_v9 = vld [vmem:[#allocation5 + $0x40] ss:$8 sps:$4 sm:$0xff]   ;;  %v641_v10 = vld [vmem:[#allocation5 + $0x54] ss:$8 sps:$4 sm:$0xff]  }
  0x3b   :  { %v643_v11 = vld [vmem:[#allocation5 + $0x50] ss:$8 sps:$4 sm:$0xff]   ;;  %v644_v12 = vld [vmem:[#allocation5 + $0x64] ss:$8 sps:$4 sm:$0xff]   ;;  %v646_v19 = vld [vmem:[#allocation5 + $0x60] ss:$8 sps:$4 sm:$0xff]  }
  0x3c   :  { %v61_v13 = vld [vmem:[#allocation2] sm:$0xff]  ;;  %v64_v14 = vld [vmem:[#allocation2 + $0x8] sm:$0xff]  ;;  %v69_v17 = vld [vmem:[#allocation2 + $0x10] sm:$0xff] }
  0x3d   :  { %313 = vmatpush1.bf16.msra.mxu0 %v631_v3  ;;  %v63_v15 = vunpack.c.h.bf16 %v61_v13  ;;  %v66_v16 = vunpack.c.h.bf16 %v64_v14  ;;  %v74_v18 = vld [vmem:[#allocation2 + $0x18] sm:$0xff]  ;;  %v71_v21 = vunpack.c.h.bf16 %v69_v17  ;;  %v858_v22 = vld [vmem:[#allocation2 + $0x20] sm:$0xff]  ;;  %v860_v25 = vld [vmem:[#allocation2 + $0x28] sm:$0xff]  ;;  %v62_v30 = vunpack.c.l.bf16 %v61_v13 }
  0x3e   :  { %314 = vmatprep.subr.bf16.mxu0 %v632_v4  ;;  %v647_v20 = vld [vmem:[#allocation5 + $0x74] ss:$8 sps:$4 sm:$0xff]   ;;  %v76_v24 = vunpack.c.h.bf16 %v74_v18  ;;  %v649_v26 = vld [vmem:[#allocation5 + $0x70] ss:$8 sps:$4 sm:$0xff]   ;;  %v862_v27 = vld [vmem:[#allocation2 + $0x30] sm:$0xff]  ;;  %v65_v31 = vunpack.c.l.bf16 %v64_v14  ;;  %v81_v33 = vunpack.c.h.bf16 %v858_v22  ;;  %v86_v38 = vunpack.c.h.bf16 %v860_v25 }
  0x3f   :  { %v68_v23 = vadd.f32 %v66_v16, %v63_v15  ;;  %v674_v28 = vld [vmem:[#allocation7 + $0x40] sm:$0xff]   ;;  %v865_v35 = vld [vmem:[#allocation2 + $0x38] sm:$0xff]  ;;  %v676_v36 = vld [vmem:[#allocation7 + $0x48] sm:$0xff]   ;;  %v70_v43 = vunpack.c.l.bf16 %v69_v17  ;;  %v91_v45 = vunpack.c.h.bf16 %v862_v27  ;;  %v75_v53 = vunpack.c.l.bf16 %v74_v18 }
  0x40   :  { %v650_v29 = vld [vmem:[#allocation5 + $0x84] ss:$8 sps:$4 sm:$0xff]   ;;  %596 = vmatprep.subr.bf16.mxu1 %v674_v28  ;;  %v652_v40 = vld [vmem:[#allocation5 + $0x80] ss:$8 sps:$4 sm:$0xff]   ;;  %v678_v41 = vld [vmem:[#allocation7 + $0x50] sm:$0xff]   ;;  %v67_v46 = vadd.f32 %v65_v31, %v62_v30  ;;  %v96_v49 = vunpack.c.h.bf16 %v865_v35  ;;  %v80_v61 = vunpack.c.l.bf16 %v858_v22  ;;  %v95_v14 = vunpack.c.l.bf16 %v865_v35 }
  0x41   :  { %315 = vmatpush1.bf16.msra.mxu0 %v634_v5  ;;  %v73_v32 = vadd.f32 %v71_v21, %v68_v23  ;;  %v675_v34 = vld [vmem:[#allocation7] sm:$0xff]   ;;  %v677_v39 = vld [vmem:[#allocation7 + $0x8] sm:$0xff]   ;;  %v653_v42 = vld [vmem:[#allocation5 + $0x94] ss:$8 sps:$4 sm:$0xff]   ;;  %v85_v5 = vunpack.c.l.bf16 %v860_v25 }
  0x42   :  { %316 = vmatprep.subr.bf16.mxu0 %v635_v6  ;;  %597 = vmatpush3.bf16.msra.mxu1 %v675_v34  ;;  %v869_v47 = vld [vmem:[#allocation2 + $0x40] sm:$0xff]  ;;  %v679_v50 = vld [vmem:[#allocation7 + $0x10] sm:$0xff]   ;;  %v72_v56 = vadd.f32 %v70_v43, %v67_v46  ;;  %v656_v57 = vld [vmem:[#allocation5 + $0xa4] ss:$8 sps:$4 sm:$0xff]  }
  0x43   :  { %v78_v37 = vadd.f32 %v76_v24, %v73_v32  ;;  %598 = vmatprep.subr.bf16.mxu1 %v676_v36  ;;  %v680_v51 = vld [vmem:[#allocation7 + $0x58] sm:$0xff]   ;;  %v101_v55 = vunpack.c.h.bf16 %v869_v47  ;;  %v682_v60 = vld [vmem:[#allocation7 + $0x60] sm:$0xff]   ;;  %v684_v4 = vld [vmem:[#allocation7 + $0x68] sm:$0xff]   ;;  %v100_v18 = vunpack.c.l.bf16 %v869_v47 }
  0x44   :  { %v655_v52 = vld [vmem:[#allocation5 + $0x90] ss:$8 sps:$4 sm:$0xff]   ;;  %v77_v63 = vadd.f32 %v75_v53, %v72_v56  ;;  %v658_v0 = vld [vmem:[#allocation5 + $0xa0] ss:$8 sps:$4 sm:$0xff]   ;;  %v659_v1 = vld [vmem:[#allocation5 + $0xb4] ss:$8 sps:$4 sm:$0xff]  }
  0x45   :  { %317 = vmatpush1.bf16.msra.mxu0 %v637_v7  ;;  %v83_v44 = vadd.f32 %v81_v33, %v78_v37  ;;  %v681_v59 = vld [vmem:[#allocation7 + $0x18] sm:$0xff]   ;;  %v683_v3 = vld [vmem:[#allocation7 + $0x20] sm:$0xff]   ;;  %v686_v25 = vld [vmem:[#allocation7 + $0x70] sm:$0xff]  }
  0x46   :  { %318 = vmatprep.subr.bf16.mxu0 %v638_v8  ;;  %599 = vmatpush3.bf16.msra.mxu1 %v677_v39  ;;  %v82_v6 = vadd.f32 %v80_v61, %v77_v63  ;;  %v661_v7 = vld [vmem:[#allocation5 + $0xb0] ss:$8 sps:$4 sm:$0xff]   ;;  %v662_v8 = vld [vmem:[#allocation5 + $0xc4] ss:$8 sps:$4 sm:$0xff]   ;;  %v665_v13 = vld [vmem:[#allocation5 + $0xd4] ss:$8 sps:$4 sm:$0xff]  }
  0x47   :  { %v88_v48 = vadd.f32 %v86_v38, %v83_v44  ;;  %600 = vmatprep.subr.bf16.mxu1 %v678_v41  ;;  %v667_v16 = vld [vmem:[#allocation5 + $0xd0] ss:$8 sps:$4 sm:$0xff]   ;;  %v668_v17 = vld [vmem:[#allocation5 + $0xe4] ss:$8 sps:$4 sm:$0xff]   ;;  %v671_v21 = vld [vmem:[#allocation5 + $0xf4] ss:$8 sps:$4 sm:$0xff]  }
  0x48   :  { %v673_v23 = vld [vmem:[#allocation5 + $0xf0] ss:$8 sps:$4 sm:$0xff]  }
  0x49   :  { %319 = vmatpush1.bf16.msra.mxu0 %v640_v9  ;;  %v93_v54 = vadd.f32 %v91_v45, %v88_v48  ;;  %v685_v9 = vld [vmem:[#allocation7 + $0x28] sm:$0xff]   ;;  %v689_v28 = vld [vmem:[#allocation7 + $0x38] sm:$0xff]  }
  0x4a   :  { %320 = vmatprep.subr.bf16.mxu0 %v641_v10  ;;  %601 = vmatpush3.bf16.msra.mxu1 %v679_v50  ;;  %v90_v10 = vunpack.c.l.bf16 %v862_v27  ;;  %v688_v27 = vld [vmem:[#allocation7 + $0x78] sm:$0xff]  }
  0x4b   :  { %v98_v58 = vadd.f32 %v96_v49, %v93_v54  ;;  %602 = vmatprep.subr.bf16.mxu1 %v680_v51  ;;  %v138_v32 = vld [vmem:[%s898_s2] sm:$0x3]  ;;  %s791_s2 = smov [#allocation8]  }
  0x4c   :  { %v579_v47 = vld [vmem:[%s900_s4] ss:$0 sm:$0xff]  ;;  %s537_s9 = sshll.u32 %s791_s2, 4  ;;  %s538_s9 = int_to_ptr.vmem [resolvable:$true] %s537_s9 }
  0x4d   :  { %321 = vmatpush1.bf16.msra.mxu0 %v643_v11  ;;  %v103_v62 = vadd.f32 %v101_v55, %v98_v58  ;;  %v87_v11 = vadd.f32 %v85_v5, %v82_v6  ;;  %s756_s10 = scalar_lea.vmem %s538_s9, 128  ;;  %p761_p11 = scmp.lt.s32.totalorder %s538_s9, %s538_s9 }
  0x4e   :  { %322 = vmatprep.subr.bf16.mxu0 %v644_v12  ;;  %603 = vmatpush3.bf16.msra.mxu1 %v681_v59  ;;  %v664_v12 = vld [vmem:[#allocation5 + $0xc0] ss:$8 sps:$4 sm:$0xff]   ;;  %p757_p10 = scmp.ne.s32.totalorder %s538_s9, %s756_s10  ;;  %p762_p12 = scmp.lt.s32.totalorder %s756_s10, %s756_s10 }
  0x4f   :  { %v105_v2 = vpack.c.bf16 %v103_v62, %v103_v62  ;;  %604 = vmatprep.subr.bf16.mxu1 %v682_v60  ;;  %v92_v15 = vadd.f32 %v90_v10, %v87_v11 }
  0x50   :  { %p763_p13 = por %p762_p12, %p761_p11 }
  0x51   :  { %323 = vmatpush1.bf16.msra.mxu0 %v646_v19  ;;  %342 = vmatprep.mubr.bf16.mxu0 %v105_v2  ;;  %v97_v19 = vadd.f32 %v95_v14, %v92_v15 }
  0x52   :  { %324 = vmatprep.subr.bf16.mxu0 %v647_v20  ;;  %605 = vmatpush3.bf16.msra.mxu1 %v683_v3  ;;  %v670_v20 = vld [vmem:[#allocation5 + $0xe0] ss:$8 sps:$4 sm:$0xff]   ;;  %p764_p0 = pnand %p763_p13, %p757_p10 }
  0x53   :  { %606 = vmatprep.subr.bf16.mxu1 %v684_v4  ;;  %v102_v22 = vadd.f32 %v100_v18, %v97_v19 }
  0x55   :  { %325 = vmatpush1.bf16.msra.mxu0 %v649_v26  ;;  %v104_v24 = vpack.c.bf16 %v102_v22, %v102_v22  ;;  %v687_v26 = vld [vmem:[#allocation7 + $0x30] sm:$0xff]  }
  0x56   :  { %326 = vmatprep.subr.bf16.mxu0 %v650_v29  ;;  %607 = vmatpush3.bf16.msra.mxu1 %v685_v9  ;;  %v140_v29 = vlaneseq }
  0x57   :  { %608 = vmatprep.subr.bf16.mxu1 %v686_v25 }
  0x58   :  { %v141_v30 = vshrl.u32 %v140_v29, 7 }
  0x59   :  { %327 = vmatpush1.bf16.msra.mxu0 %v652_v40 }
  0x5a   :  { %328 = vmatprep.subr.bf16.mxu0 %v653_v42  ;;  %609 = vmatpush3.bf16.msra.mxu1 %v687_v26  ;;  %v142_v31 = vsub.s32 0, %v141_v30  ;;  %v146_v33 = vsub.s32 1, %v141_v30 }
  0x5b   :  { %610 = vmatprep.subr.bf16.mxu1 %v688_v27 }
  0x5c   :  { %v143_v34 = vrot.slane %v138_v32, %v142_v31  ;;  %v147_v35 = vrot.slane %v138_v32, %v146_v33 }
  0x5d   :  { %329 = vmatpush1.bf16.msra.mxu0 %v655_v52 }
  0x5e   :  { %330 = vmatprep.subr.bf16.mxu0 %v656_v57  ;;  %611 = vmatpush3.bf16.msra.mxu1 %v689_v28 }
  0x61   :  { %331 = vmatpush1.bf16.msra.mxu0 %v658_v0 }
  0x62   :  { %332 = vmatprep.subr.bf16.mxu0 %v659_v1 }
  0x65   :  { %333 = vmatpush1.bf16.msra.mxu0 %v661_v7 }
  0x66   :  { %334 = vmatprep.subr.bf16.mxu0 %v662_v8 }
  0x69   :  { %335 = vmatpush1.bf16.msra.mxu0 %v664_v12 }
  0x6a   :  { %336 = vmatprep.subr.bf16.mxu0 %v665_v13 }
  0x6d   :  { %337 = vmatpush1.bf16.msra.mxu0 %v667_v16 }
  0x6e   :  { %338 = vmatprep.subr.bf16.mxu0 %v668_v17 }
  0x71   :  { %339 = vmatpush1.bf16.msra.mxu0 %v670_v20 }
  0x72   :  { %340 = vmatprep.subr.bf16.mxu0 %v671_v21 }
  0x75   :  { %341 = vmatpush1.bf16.msra.mxu0 %v673_v23 }
  0x78   :  { %343 = vmatmul.mubr.bf16.vlgmr.msra.gmra.mrb[0].mxu0 %v104_v24 }
 0x14b   :  { %v344_v36 = vpop.f32.mrb[0].mxu0 }
 0x14c   :  { %v345_v37 = vadd.f32 %v344_v36, %v143_v34  ;;  %v346_v38 = vpop.f32.mrb[1].mxu0 }
 0x14d   :  { %v347_v39 = vadd.f32 %v346_v38, %v147_v35  ;;  %v348_v40 = vpop.f32.mrb[2].mxu0 }
 0x14e   :  { %v351_v41 = vmax.f32 %v345_v37, 0.0  ;;  %v349_v42 = vpop.f32.mrb[3].mxu0 }
 0x14f   :  { %v352_v43 = vmax.f32 %v347_v39, 0.0 }
 0x150   :  { %v353_v45 = vpack.c.bf16 %v351_v41, %v351_v41 }
 0x151   :  { %v354_v44 = vpack.c.bf16 %v352_v43, %v352_v43 }
 0x153   :  { %522 = vmatprep.mubr.bf16.mxu1 %v354_v44 }
 0x154   :  { %523 = vmatmul.mubr.bf16.vlgmr.msra.gmra.mrb[0].mxu1 %v353_v45 }
 0x227   :  { %v612_v46 = vpop.f32.mrb[0].mxu1 }
 0x228   :  { %v613_v48 = vpop.f32.mrb[1].mxu1 }
 0x229   :  { %v614_v49 = vadd.f32 %v613_v48, %v612_v46  ;;  %v615_v50 = vpop.f32.mrb[2].mxu1 }
 0x22a   :  { %v616_v51 = vpop.f32.mrb[3].mxu1 }
 0x22b   :  { %v525_v52 = vadd.f32 %v614_v49, %v579_v47 }
 0x22d   :  { %530 = vst [vmem:[#allocation8] sm:$0xff] %v525_v52 }
 0x22e   :  { %767 = shalt.err (!%p764_p0)
}
 0x22f   :  { %s768_s4 = scalar_lea.hbm %s901_s5, 128 }
 0x230   :  { %p769_p1 = scmp.ne.s32.totalorder %s901_s5, %s768_s4  ;;  %p772_p2 = scmp.lt.u32.totalorder %s768_s4, %s901_s5 }
 0x232   :  { %p774_p3 = pnand %p772_p2, %p769_p1 }
 0x234   :  { %777 = shalt.err (!%p774_p3)
}
 0x235   :  { %540 = dma.vmem_to_hbm [thread:$0]  %s538_s9, 128, %s901_s5, [#allocation4]  }
 0x236   :  { %782 = dma.done.wait [#allocation4], 128  }
 0x237   :  { %783 = vsyncadd [#allocation4], 4294967168 }
 0x238   :  { %544 = vsyncpa [#allocation3], 1 }
 0x239   :  { %545 = vsyncpa [#allocation6], 1 }
 0x23a   :  { %546 = vsyncpa [#allocation4], 1 }

</bundles_post_ra>
